<compile_context>
chip_gen: v6e
topology: v6e:2x2x1
jax: 0.10.0
libtpu: 0.0.40
codegen_flags: <defaults>
</compile_context>

<pallas_src>
import functools
import math

import jax
import jax.numpy as jnp
from jax.experimental import pallas as pl
from jax.experimental.pallas import tpu as pltpu

# ---- synthetic "args" (small, consistent with the module) -------------------
LATDIM = 32
ATT_HEAD = 4
N_NODES = 8
HEAD_DIM = LATDIM // ATT_HEAD

_MAX_KN_TILE = 512  # cap for contraction / output-column tiles (mult of 128)


# ---- hardware query ----------------------------------------------------------
def _vmem_capacity_bytes() -> int:
    try:
        return int(pltpu.get_tpu_info().vmem_capacity_bytes)
    except Exception:
        return 64 * 1024 * 1024  # conservative: v7x per-TensorCore VMEM


# ---- tile selection ----------------------------------------------------------
def _largest_divisor_tile(dim: int, quantum: int, cap: int) -> int:
    """Largest t <= cap that divides `dim` and is a multiple of `quantum`.
    Returns `dim` itself when dim <= cap (full-dim blocks are always legal)."""
    if dim <= cap:
        return dim
    t = (cap // quantum) * quantum
    while t >= quantum:
        if dim % t == 0:
            return t
        t -= quantum
    # Pathological (no divisor that is a multiple of `quantum`): full dim.
    # Never produces an edge block on the contraction axis.
    return dim


def _pick_row_tile(n: int, bytes_per_row: int, vmem_cap: int) -> int:
    """Row tile: full N for small problems; otherwise sized so each x tile is
    several MiB (amortizes the ~0.35us per-grid-step overhead) while keeping
    >= 2 row blocks so the parallel i axis can shard across v7x's 2 TCs."""
    if n <= 1024:
        return n
    target = 4 * (1 << 20) if vmem_cap <= 64 * (1 << 20) else 8 * (1 << 20)
    tm = (target // max(bytes_per_row, 1)) // 8 * 8
    tm = max(512, tm)
    half = max(512, ((n + 1) // 2 + 7) // 8 * 8)  # -> at least 2 row blocks
    tm = min(tm, half, n)
    return max(8, tm // 8 * 8)


# ---- Pallas kernels ----------------------------------------------------------
def _proj_kernel_single(x_ref, w_ref, o_ref, *, compute_dtype):
    # Single contraction block: no accumulator scratch, dot -> store.
    x = x_ref[...]
    w = w_ref[...]
    if compute_dtype is not None:
        x = x.astype(compute_dtype)   # cast on the VMEM tile, not in HBM
        w = w.astype(compute_dtype)
    o_ref[...] = jnp.dot(x, w, preferred_element_type=jnp.float32).astype(o_ref.dtype)


def _proj_kernel_acc(x_ref, w_ref, o_ref, acc_ref, *, compute_dtype):
    # Tiled contraction: f32 VMEM accumulator, init on k==0, store on k==last.
    @pl.when(pl.program_id(2) == 0)
    def _():
        acc_ref[...] = jnp.zeros_like(acc_ref)

    x = x_ref[...]
    w = w_ref[...]
    if compute_dtype is not None:
        x = x.astype(compute_dtype)
        w = w.astype(compute_dtype)
    acc_ref[...] += jnp.dot(x, w, preferred_element_type=jnp.float32)

    @pl.when(pl.program_id(2) == pl.num_programs(2) - 1)
    def _():
        o_ref[...] = acc_ref[...].astype(o_ref.dtype)


# ---- wrapper -----------------------------------------------------------------
def prepare_proj_flat(x: jax.Array, W: jax.Array, *,
                      out_dtype=None, compute_dtype=None) -> jax.Array:
    """x @ W as a Pallas kernel. Returns the lane-dense [N, d_out] slab.

    W may be rectangular, e.g. a concatenated [latdim, 3*latdim] QKV weight
    (reads x from HBM once and triples the output lane width).
    """
    n, d_in = x.shape
    assert W.shape[0] == d_in
    d_out = W.shape[1]
    out_dtype = out_dtype if out_dtype is not None else x.dtype

    x_item = jnp.dtype(x.dtype).itemsize
    w_item = jnp.dtype(W.dtype).itemsize
    o_item = jnp.dtype(out_dtype).itemsize

    vmem_cap = _vmem_capacity_bytes()

    tk = _largest_divisor_tile(d_in, 128, _MAX_KN_TILE)   # divisor: no K-edge blocks
    tn = _largest_divisor_tile(d_out, 128, _MAX_KN_TILE)
    tm = _pick_row_tile(n, d_in * x_item, vmem_cap)

    k_blocks = d_in // tk
    grid_m = pl.cdiv(n, tm)        # edge blocks on M are fine (masked store)
    grid_n = pl.cdiv(d_out, tn)

    cost = pl.CostEstimate(
        flops=2 * n * d_in * d_out,
        transcendentals=0,
        bytes_accessed=n * d_in * x_item + d_in * d_out * w_item + n * d_out * o_item,
    )

    if k_blocks == 1:
        kernel = functools.partial(_proj_kernel_single, compute_dtype=compute_dtype)
        grid = (grid_m, grid_n)
        in_specs = [
            pl.BlockSpec((tm, d_in), lambda i, j: (i, 0)),
            pl.BlockSpec((d_in, tn), lambda i, j: (0, j)),  # weight stays resident
        ]
        out_specs = pl.BlockSpec((tm, tn), lambda i, j: (i, j))
        scratch_shapes = []
        dim_sem = ("parallel", "parallel")
        vmem_need = (2 * tm * d_in * x_item + 2 * d_in * tn * w_item
                     + 2 * tm * tn * o_item)
    else:
        kernel = functools.partial(_proj_kernel_acc, compute_dtype=compute_dtype)
        grid = (grid_m, grid_n, k_blocks)  # reduction axis last, "arbitrary"
        in_specs = [
            pl.BlockSpec((tm, tk), lambda i, j, k: (i, k)),
            pl.BlockSpec((tk, tn), lambda i, j, k: (k, j)),
        ]
        out_specs = pl.BlockSpec((tm, tn), lambda i, j, k: (i, j))
        scratch_shapes = [pltpu.VMEM((tm, tn), jnp.float32)]
        dim_sem = ("parallel", "parallel", "arbitrary")
        vmem_need = (2 * tm * tk * x_item + 2 * tk * tn * w_item
                     + 2 * tm * tn * o_item + tm * tn * 4)

    # Honest (not 2x padded) budget, clamped per generation, never below need.
    vmem_limit = max(vmem_need + (2 << 20), 16 << 20)
    vmem_limit = min(vmem_limit, int(0.9 * vmem_cap))
    vmem_limit = int(max(vmem_limit, vmem_need + (1 << 20)))

    return pl.pallas_call(
        kernel,
        out_shape=jax.ShapeDtypeStruct((n, d_out), out_dtype),
        grid_spec=pltpu.PrefetchScalarGridSpec(
            num_scalar_prefetch=0,
            grid=grid,
            in_specs=in_specs,
            out_specs=out_specs,
            scratch_shapes=scratch_shapes,
        ),
        compiler_params=pltpu.CompilerParams(
            dimension_semantics=dim_sem,
            vmem_limit_bytes=vmem_limit,
        ),
        cost_estimate=cost,
    )(x, W)


def prepare_key(node_embed: jax.Array, K: jax.Array, att_head: int, *,
                out_dtype=None, compute_dtype=None) -> jax.Array:
    """Full prepareKey.forward semantics: [att_head, N, latdim // att_head].

    The reshape/permute is plain-JAX glue on the kernel output.  At scale,
    prefer consuming prepare_proj_flat()'s [N, latdim] slab directly (per-head
    column slices are contiguous); the permuted layout has an 8-wide minor dim
    and costs an extra HBM round trip at masked-store efficiency.
    """
    n, latdim = node_embed.shape
    head_dim = latdim // att_head
    key_flat = prepare_proj_flat(node_embed, K,
                                 out_dtype=out_dtype, compute_dtype=compute_dtype)
    return jnp.transpose(key_flat.reshape(n, att_head, head_dim), (1, 0, 2))


# ---- deterministic parameter init (xavier_uniform, as in the module) --------
def xavier_uniform(key, shape, dtype=jnp.float32):
    fan_in, fan_out = shape
    bound = math.sqrt(6.0 / (fan_in + fan_out))
    return jax.random.uniform(key, shape, dtype=dtype, minval=-bound, maxval=bound)


if __name__ == "__main__":
    root = jax.random.PRNGKey(0)
    k_x, k_w, k_q, k_v, k_x2, k_w2 = jax.random.split(root, 6)

    node_embed = jax.random.normal(k_x, (N_NODES, LATDIM), dtype=jnp.float32)
    K = xavier_uniform(k_w, (LATDIM, LATDIM))

    ref = jnp.transpose((node_embed @ K).reshape(-1, ATT_HEAD, HEAD_DIM), (1, 0, 2))

    # 1) f32 path: exact module semantics (single-k fast path, no acc scratch).
    out = jax.block_until_ready(prepare_key(node_embed, K, ATT_HEAD))
    assert out.shape == (ATT_HEAD, N_NODES, HEAD_DIM)
    assert jnp.allclose(out, ref, atol=1e-5, rtol=1e-5)

    # 2) bf16 path: weight stored in bf16 (one-time offline cast), activation
    #    cast to bf16 inside the kernel on the VMEM tile (no wrapper-side HBM
    #    round trip), bf16 output slab cast from the f32 accumulator.
    K_bf16 = K.astype(jnp.bfloat16)
    out_bf16 = jax.block_until_ready(
        prepare_key(node_embed, K_bf16, ATT_HEAD,
                    compute_dtype=jnp.bfloat16, out_dtype=jnp.bfloat16))
    assert out_bf16.shape == (ATT_HEAD, N_NODES, HEAD_DIM)
    assert jnp.allclose(out_bf16.astype(jnp.float32), ref, atol=1e-1, rtol=1e-1)

    # 3) multi-k accumulator path: latdim=640 > 512 forces tk=128, 5 k-blocks
    #    (exercises the pl.when init/writeback path the review flagged).
    LATDIM2, N2, HEADS2 = 640, 64, 4
    x2 = jax.random.normal(k_x2, (N2, LATDIM2), dtype=jnp.float32)
    W2 = xavier_uniform(k_w2, (LATDIM2, LATDIM2))
    ref2 = jnp.transpose((x2 @ W2).reshape(-1, HEADS2, LATDIM2 // HEADS2), (1, 0, 2))
    out2 = jax.block_until_ready(prepare_key(x2, W2, HEADS2))
    assert out2.shape == (HEADS2, N2, LATDIM2 // HEADS2)
    assert jnp.allclose(out2, ref2, atol=1e-3, rtol=1e-3)

    # 4) Fused Q/K/V projection: one kernel over a concatenated weight reads x
    #    from HBM once and widens the output lane dim 3x.
    Q = xavier_uniform(k_q, (LATDIM, LATDIM))
    V = xavier_uniform(k_v, (LATDIM, LATDIM))
    W_qkv = jnp.concatenate([Q, K, V], axis=1)
    qkv = jax.block_until_ready(prepare_proj_flat(node_embed, W_qkv))
    key_slice = qkv[:, LATDIM:2 * LATDIM]
    key_flat = prepare_proj_flat(node_embed, K)
    assert jnp.allclose(key_slice, key_flat, atol=1e-5, rtol=1e-5)

    # TODO(synk): at production scale, also fuse the attention-score matmul so
    # the [N, latdim] key slab never round-trips HBM in the permuted
    # [att_head, N, head_dim] layout (8-wide minor dim).

    print("KERNEL_OK")
</pallas_src>

<mosaic_0001>
module attributes {stable_mosaic.version = 11 : i64} {
  func.func @_proj_kernel_single(%arg0: i32, %arg1: i32, %arg2: memref<8x32xf32, #tpu.memory_space<vmem>>, %arg3: memref<32x32xf32, #tpu.memory_space<vmem>>, %arg4: memref<8x32xf32, #tpu.memory_space<vmem>>) attributes {dimension_semantics = [#tpu.dimension_semantics<parallel>, #tpu.dimension_semantics<parallel>], iteration_bounds = array<i64: 1, 1>, scalar_prefetch = 0 : i64, scratch_operands = 0 : i64, tpu.core_type = #tpu.core_type<tc>, window_params = [{transform_indices = @transform_0, window_bounds = array<i64: 8, 32>}, {transform_indices = @transform_1, window_bounds = array<i64: 32, 32>}, {transform_indices = @transform_2, window_bounds = array<i64: 8, 32>}]} {
    %c0 = arith.constant 0 : index
    %c0_0 = arith.constant 0 : index
    %0 = vector.load %arg2[%c0, %c0_0] : memref<8x32xf32, #tpu.memory_space<vmem>>, vector<8x32xf32>
    %c0_1 = arith.constant 0 : index
    %c0_2 = arith.constant 0 : index
    %1 = vector.load %arg3[%c0_1, %c0_2] : memref<32x32xf32, #tpu.memory_space<vmem>>, vector<32x32xf32>
    %cst = arith.constant dense<0.000000e+00> : vector<8x32xf32>
    %2 = tpu.matmul %0, %1, %cst {dimension_numbers = #tpu.dot_dimension_numbers<[1], [0], [0], [1], [0, 0, 1, 1], [], []>} : vector<8x32xf32>, vector<32x32xf32>, vector<8x32xf32> -> vector<8x32xf32>
    %c0_3 = arith.constant 0 : index
    %c0_4 = arith.constant 0 : index
    %3 = vector.load %arg4[%c0_3, %c0_4] : memref<8x32xf32, #tpu.memory_space<vmem>>, vector<8x32xf32>
    tpu.vector_store %arg4[%c0_3, %c0_4], %2 {strides = array<i32>} : memref<8x32xf32, #tpu.memory_space<vmem>>, vector<8x32xf32>,
    return
  }
  func.func @transform_0(%arg0: i32, %arg1: i32) -> (i32, i32) {
    %c0_i32 = arith.constant 0 : i32
    %c0_i32_0 = arith.constant 0 : i32
    return %arg0, %c0_i32 : i32, i32
  }
  func.func @transform_1(%arg0: i32, %arg1: i32) -> (i32, i32) {
    %c0_i32 = arith.constant 0 : i32
    %c0_i32_0 = arith.constant 0 : i32
    return %c0_i32, %arg1 : i32, i32
  }
  func.func @transform_2(%arg0: i32, %arg1: i32) -> (i32, i32) {
    %c0_i32 = arith.constant 0 : i32
    return %arg0, %arg1 : i32, i32
  }
}

</mosaic_0001>

<bundles_post_ra>
// kernel: tpu_custom_call.1
= control target key start
LH: loop header
LB: loop body
LE: loop exit
PB: predicated region body
PF: predicated region fallthrough
CT: control target
= control target key end

     0   :  { %7 = vsyncpa [#allocation3], 0  ;;  %s255_s0 = inlined_call_operand.hbm [shape: f32[8,32], index: 0, kind: input, shape index: {}]   ;;  %s256_s1 = inlined_call_operand.hbm [shape: f32[32,32], index: 1, kind: input, shape index: {}]   ;;  %s257_s2 = inlined_call_operand.hbm [shape: f32[8,32], index: 2, kind: output, shape index: {}]  }
   0x1   :  { %8 = vsyncpa [#allocation6], 0 }
   0x2   :  { %9 = vsyncpa [#allocation4], 0  ;;  %s224_s9 = smov [#allocation2]   ;;  %s225_s11 = smov [#allocation5]  }
   0x3   :  { %s16_s10 = sshll.u32 %s224_s9, 4  ;;  %s25_s12 = sshll.u32 %s225_s11, 4  ;;  %s17_s10 = int_to_ptr.vmem [resolvable:$true] %s16_s10  ;;  %s26_s12 = int_to_ptr.vmem [resolvable:$true] %s25_s12 }
   0x4   :  { %s166_s13 = scalar_lea.vmem %s17_s10, 128  ;;  %p171_p1 = scmp.lt.s32.totalorder %s17_s10, %s17_s10 }
   0x5   :  { %p167_p0 = scmp.ne.s32.totalorder %s17_s10, %s166_s13  ;;  %p172_p2 = scmp.lt.s32.totalorder %s166_s13, %s166_s13 }
   0x7   :  { %p173_p3 = por %p172_p2, %p171_p1 }
   0x9   :  { %p174_p4 = pnand %p173_p3, %p167_p0 }
   0xb   :  { %177 = shalt.err (!%p174_p4)
}
   0xc   :  { %19 = dma.hbm_to_vmem [thread:$0]  %s255_s0, 128, %s17_s10, [#allocation3]  }
   0xd   :  { %s186_s16 = scalar_lea.vmem %s26_s12, 512  ;;  %p191_p6 = scmp.lt.s32.totalorder %s26_s12, %s26_s12 }
   0xe   :  { %p187_p5 = scmp.ne.s32.totalorder %s26_s12, %s186_s16  ;;  %p192_p7 = scmp.lt.s32.totalorder %s186_s16, %s186_s16 }
  0x10   :  { %p193_p8 = por %p192_p7, %p191_p6 }
  0x12   :  { %p194_p9 = pnand %p193_p8, %p187_p5 }
  0x14   :  { %197 = shalt.err (!%p194_p9)
}
  0x15   :  { %s226_s17 = smov 128   ;;  %s227_s18 = smov 8  }
  0x16   :  { %31 = dma.hbm_to_vmem [thread:$0]  %s256_s1, 512, %s26_s12, [#allocation6], %s226_s17, %s226_s17, %s227_s18  }
  0x17   :  { %218 = dma.done.wait [#allocation3], 128  }
  0x18   :  { %219 = vsyncadd [#allocation3], 4294967168 }
  0x19   :  { %220 = dma.done.wait [#allocation6], 512  }
  0x1a   :  { %221 = vsyncadd [#allocation6], 4294966784  ;;  %v228_v0 = vmov 0.0   ;;  %vm229_vm0 = vmmov 0   ;;  %v42_v1 = vld [vmem:[#allocation5 + $0x18] sm:$0xff]  ;;  %v41_v2 = vld [vmem:[#allocation5 + $0x10] sm:$0xff] }
  0x1b   :  { %140 = vmatprep.subr.mxu0 %v228_v0  ;;  %148 = vmatprep.mubr.msk.f32.mxu0 %vm229_vm0, %v228_v0  ;;  %v40_v3 = vld [vmem:[#allocation5 + $0x8] sm:$0xff]  ;;  %v39_v4 = vld [vmem:[#allocation5] sm:$0xff]  ;;  %v38_v5 = vld [vmem:[#allocation2] sm:$0xff]  ;;  %vm43_vm1 = vcmask 261120   ;;  %s230_s0 = smov [#allocation7]  }
  0x1c   :  { %141 = vmatpush3.msra.mxu0 %v42_v1  ;;  %s124_s1 = sshll.u32 %s230_s0, 4  ;;  %s125_s1 = int_to_ptr.vmem [resolvable:$true] %s124_s1 }
  0x1d   :  { %142 = vmatprep.subr.mxu0 %v228_v0  ;;  %s198_s21 = scalar_lea.vmem %s125_s1, 128  ;;  %p203_p11 = scmp.lt.s32.totalorder %s125_s1, %s125_s1 }
  0x1e   :  { %143 = vmatpush3.msra.mxu0 %v41_v2  ;;  %p199_p10 = scmp.ne.s32.totalorder %s125_s1, %s198_s21  ;;  %p204_p12 = scmp.lt.s32.totalorder %s198_s21, %s198_s21 }
  0x1f   :  { %144 = vmatprep.subr.mxu0 %v228_v0 }
  0x20   :  { %145 = vmatpush3.msra.mxu0 %v40_v3  ;;  %p205_p13 = por %p204_p12, %p203_p11 }
  0x21   :  { %146 = vmatprep.subr.mxu0 %v228_v0 }
  0x22   :  { %147 = vmatpush3.msra.mxu0 %v39_v4  ;;  %p206_p0 = pnand %p205_p13, %p199_p10 }
  0x23   :  { %149 = vmatmul.mubr.msk.f32.vlgmr.msra.gmra.mxu0 %vm43_vm1, %v38_v5 }
  0xe3   :  { %v113_v6 = vpop.f32.mrf.mxu0 }
  0xe4   :  { %117 = vst.msk [vmem:[#allocation7] sm:$0xff] %vm43_vm1, %v113_v6 }
  0xe5   :  { %v150_v7 = vpop.f32.mrf.mxu0 }
  0xe6   :  { %209 = shalt.err (!%p206_p0)
}
  0xe7   :  { %127 = dma.vmem_to_hbm [thread:$0]  %s125_s1, 128, %s257_s2, [#allocation4]  }
  0xe8   :  { %222 = dma.done.wait [#allocation4], 128  }
  0xe9   :  { %223 = vsyncadd [#allocation4], 4294967168 }
  0xea   :  { %131 = vsyncpa [#allocation3], 1 }
  0xeb   :  { %132 = vsyncpa [#allocation6], 1 }
  0xec   :  { %133 = vsyncpa [#allocation4], 1 }

</bundles_post_ra>
